<compile_context>
chip_gen: v5e
topology: v5e:2x2
jax: 0.10.0
libtpu: 0.0.40
codegen_flags: <defaults>
</compile_context>

<pallas_src>
import jax
import jax.numpy as jnp
from jax import lax
from jax.experimental import pallas as pl
from jax.experimental.pallas import tpu as pltpu

N_EMBED = 384
EPS = 1e-5


def addnorm_kernel(xb_ref, x_ref, w_ref, b_ref, o_ref):
    # residual add in f32 for numerics
    s = xb_ref[...].astype(jnp.float32) + x_ref[...].astype(jnp.float32)
    # per-row mean / variance over the feature (last) axis
    mean = jnp.mean(s, axis=-1, keepdims=True)
    centered = s - mean
    var = jnp.mean(centered * centered, axis=-1, keepdims=True)
    inv = lax.rsqrt(var + EPS)
    y = centered * inv
    # elementwise affine (gamma, beta broadcast over rows)
    w = w_ref[...].astype(jnp.float32)
    b = b_ref[...].astype(jnp.float32)
    o_ref[...] = (y * w + b).astype(o_ref.dtype)


def _round_up(a, b):
    return ((a + b - 1) // b) * b


def add_norm(x_before, x, weight, bias, *, tm=512):
    assert x_before.shape == x.shape
    assert x_before.dtype == x.dtype
    orig_shape = x.shape
    C = orig_shape[-1]
    xb2 = x_before.reshape(-1, C)
    x2 = x.reshape(-1, C)
    R = xb2.shape[0]

    # Sublane granularity for the row tile: 8 rows (f32), 16 rows (bf16).
    sub = 16 if x.dtype == jnp.bfloat16 else 8

    # Row tile: as large as requested (mem-bound -> amortize per-step
    # overhead), but no larger than half the rows need, so the grid has >= 2
    # steps and shards evenly across v7x's 2 TensorCores.
    tile = max(sub, min(_round_up(tm, sub), _round_up(pl.cdiv(R, 2), sub)))

    # Remainder path: pad rows to a tile multiple, slice padding off afterwards.
    # Padded rows are all-zero -> mean 0, var 0, rsqrt(eps) finite -> no NaNs.
    Rp = _round_up(R, tile)
    if Rp != R:
        pad_rows = Rp - R
        xb2 = jnp.pad(xb2, ((0, pad_rows), (0, 0)))
        x2 = jnp.pad(x2, ((0, pad_rows), (0, 0)))

    w2 = weight.reshape(1, C)
    b2 = bias.reshape(1, C)

    out = pl.pallas_call(
        addnorm_kernel,
        out_shape=jax.ShapeDtypeStruct((Rp, C), x.dtype),
        grid_spec=pltpu.PrefetchScalarGridSpec(
            num_scalar_prefetch=0,
            grid=(Rp // tile,),
            in_specs=[
                pl.BlockSpec((tile, C), lambda i: (i, 0)),
                pl.BlockSpec((tile, C), lambda i: (i, 0)),
                pl.BlockSpec((1, C), lambda i: (0, 0)),
                pl.BlockSpec((1, C), lambda i: (0, 0)),
            ],
            out_specs=pl.BlockSpec((tile, C), lambda i: (i, 0)),
        ),
        compiler_params=pltpu.CompilerParams(
            dimension_semantics=("parallel",),
            # portable across v5e (16 MiB default scoped) / v6e / v7x (64 MiB
            # physical): explicit limit with headroom for double-buffered tiles.
            vmem_limit_bytes=48 * 1024 * 1024,
        ),
    )(xb2, x2, w2, b2)

    if Rp != R:
        out = out[:R]
    return out.reshape(orig_shape)


def add_norm_ref(x_before, x, weight, bias):
    s = x_before.astype(jnp.float32) + x.astype(jnp.float32)
    mean = jnp.mean(s, axis=-1, keepdims=True)
    var = jnp.mean((s - mean) ** 2, axis=-1, keepdims=True)
    y = (s - mean) * lax.rsqrt(var + EPS)
    return (y * weight + bias).astype(x.dtype)


if __name__ == "__main__":
    key = jax.random.PRNGKey(0)
    k1, k2, k3, k4 = jax.random.split(key, 4)

    # LayerNorm parameters (PyTorch default is ones/zeros; perturbed to
    # exercise the affine path).
    weight = 1.0 + 0.1 * jax.random.normal(k3, (N_EMBED,), dtype=jnp.float32)
    bias = 0.1 * jax.random.normal(k4, (N_EMBED,), dtype=jnp.float32)

    # Small f32 case (B*T = 16 rows -> 2 tiles of 8, no padding needed).
    B, T, C = 2, 8, N_EMBED
    x_before = jax.random.normal(k1, (B, T, C), dtype=jnp.float32)
    x = jax.random.normal(k2, (B, T, C), dtype=jnp.float32)

    out = add_norm(x_before, x, weight, bias)
    jax.block_until_ready(out)
    ref = add_norm_ref(x_before, x, weight, bias)
    assert out.shape == (B, T, C)
    assert jnp.allclose(out, ref, atol=1e-4, rtol=1e-4)

    # Larger bf16 case exercising the remainder path (2000 rows, tile=512,
    # padded to 2048) and the bf16 16-row sublane constraint.
    B2, T2 = 4, 500
    xb_l = jax.random.normal(k1, (B2, T2, C), dtype=jnp.bfloat16)
    x_l = jax.random.normal(k2, (B2, T2, C), dtype=jnp.bfloat16)
    out_l = add_norm(xb_l, x_l, weight, bias)
    jax.block_until_ready(out_l)
    ref_l = add_norm_ref(xb_l, x_l, weight, bias)
    assert out_l.shape == (B2, T2, C)
    assert jnp.allclose(out_l.astype(jnp.float32), ref_l.astype(jnp.float32),
                        atol=3e-2, rtol=3e-2)

    print("KERNEL_OK")
</pallas_src>

<mosaic_0001>
module attributes {stable_mosaic.version = 11 : i64} {
  func.func @addnorm_kernel(%arg0: i32, %arg1: memref<8x384xf32, #tpu.memory_space<vmem>>, %arg2: memref<8x384xf32, #tpu.memory_space<vmem>>, %arg3: memref<1x384xf32, #tpu.memory_space<vmem>>, %arg4: memref<1x384xf32, #tpu.memory_space<vmem>>, %arg5: memref<8x384xf32, #tpu.memory_space<vmem>>) attributes {dimension_semantics = [#tpu.dimension_semantics<parallel>], iteration_bounds = array<i64: 2>, scalar_prefetch = 0 : i64, scratch_operands = 0 : i64, tpu.core_type = #tpu.core_type<tc>, window_params = [{transform_indices = @transform_0, window_bounds = array<i64: 8, 384>}, {transform_indices = @transform_1, window_bounds = array<i64: 8, 384>}, {pipeline_mode = #tpu.pipeline_mode<synchronous>, transform_indices = @transform_2, window_bounds = array<i64: 1, 384>}, {pipeline_mode = #tpu.pipeline_mode<synchronous>, transform_indices = @transform_3, window_bounds = array<i64: 1, 384>}, {transform_indices = @transform_4, window_bounds = array<i64: 8, 384>}]} {
    %c0 = arith.constant 0 : index
    %c0_0 = arith.constant 0 : index
    %0 = vector.load %arg1[%c0, %c0_0] : memref<8x384xf32, #tpu.memory_space<vmem>>, vector<8x384xf32>
    %c0_1 = arith.constant 0 : index
    %c0_2 = arith.constant 0 : index
    %1 = vector.load %arg2[%c0_1, %c0_2] : memref<8x384xf32, #tpu.memory_space<vmem>>, vector<8x384xf32>
    %2 = arith.addf %0, %1 : vector<8x384xf32>
    %cst = arith.constant dense<0.000000e+00> : vector<8xf32>
    %3 = vector.multi_reduction <add>, %2, %cst [1] : vector<8x384xf32> to vector<8xf32>
    %4 = vector.shape_cast %3 : vector<8xf32> to vector<8x1xf32>
    %cst_3 = arith.constant 3.840000e+02 : f32
    %5 = vector.broadcast %cst_3 : f32 to vector<8x1xf32>
    %6 = arith.divf %4, %5 : vector<8x1xf32>
    %7 = vector.broadcast %6 : vector<8x1xf32> to vector<8x384xf32>
    %8 = arith.subf %2, %7 : vector<8x384xf32>
    %9 = arith.mulf %8, %8 : vector<8x384xf32>
    %cst_4 = arith.constant dense<0.000000e+00> : vector<8xf32>
    %10 = vector.multi_reduction <add>, %9, %cst_4 [1] : vector<8x384xf32> to vector<8xf32>
    %11 = vector.shape_cast %10 : vector<8xf32> to vector<8x1xf32>
    %cst_5 = arith.constant 3.840000e+02 : f32
    %12 = vector.broadcast %cst_5 : f32 to vector<8x1xf32>
    %13 = arith.divf %11, %12 : vector<8x1xf32>
    %cst_6 = arith.constant 9.99999974E-6 : f32
    %14 = vector.broadcast %cst_6 : f32 to vector<8x1xf32>
    %15 = arith.addf %13, %14 : vector<8x1xf32>
    %16 = math.rsqrt %15 : vector<8x1xf32>
    %17 = vector.broadcast %16 : vector<8x1xf32> to vector<8x384xf32>
    %18 = arith.mulf %8, %17 : vector<8x384xf32>
    %c0_7 = arith.constant 0 : index
    %c0_8 = arith.constant 0 : index
    %19 = vector.load %arg3[%c0_7, %c0_8] : memref<1x384xf32, #tpu.memory_space<vmem>>, vector<1x384xf32>
    %c0_9 = arith.constant 0 : index
    %c0_10 = arith.constant 0 : index
    %20 = vector.load %arg4[%c0_9, %c0_10] : memref<1x384xf32, #tpu.memory_space<vmem>>, vector<1x384xf32>
    %21 = vector.broadcast %19 : vector<1x384xf32> to vector<8x384xf32>
    %22 = arith.mulf %18, %21 : vector<8x384xf32>
    %23 = vector.broadcast %20 : vector<1x384xf32> to vector<8x384xf32>
    %24 = arith.addf %22, %23 : vector<8x384xf32>
    %c0_11 = arith.constant 0 : index
    %c0_12 = arith.constant 0 : index
    %25 = vector.load %arg5[%c0_11, %c0_12] : memref<8x384xf32, #tpu.memory_space<vmem>>, vector<8x384xf32>
    tpu.vector_store %arg5[%c0_11, %c0_12], %24 {strides = array<i32>} : memref<8x384xf32, #tpu.memory_space<vmem>>, vector<8x384xf32>,
    return
  }
  func.func @transform_0(%arg0: i32) -> (i32, i32) {
    %c0_i32 = arith.constant 0 : i32
    %c0_i32_0 = arith.constant 0 : i32
    return %arg0, %c0_i32 : i32, i32
  }
  func.func @transform_1(%arg0: i32) -> (i32, i32) {
    %c0_i32 = arith.constant 0 : i32
    %c0_i32_0 = arith.constant 0 : i32
    return %arg0, %c0_i32 : i32, i32
  }
  func.func @transform_2(%arg0: i32) -> (i32, i32) {
    %c0_i32 = arith.constant 0 : i32
    %c0_i32_0 = arith.constant 0 : i32
    %c0_i32_1 = arith.constant 0 : i32
    return %c0_i32, %c0_i32_0 : i32, i32
  }
  func.func @transform_3(%arg0: i32) -> (i32, i32) {
    %c0_i32 = arith.constant 0 : i32
    %c0_i32_0 = arith.constant 0 : i32
    %c0_i32_1 = arith.constant 0 : i32
    return %c0_i32, %c0_i32_0 : i32, i32
  }
  func.func @transform_4(%arg0: i32) -> (i32, i32) {
    %c0_i32 = arith.constant 0 : i32
    %c0_i32_0 = arith.constant 0 : i32
    return %arg0, %c0_i32 : i32, i32
  }
}

</mosaic_0001>

<bundles_post_ra>
// kernel: tpu_custom_call.1
= control target key start
LH: loop header
LB: loop body
LE: loop exit
PB: predicated region body
PF: predicated region fallthrough
CT: control target
= control target key end

     0   :  { %s982_s0 = inlined_call_operand.hbm [shape: f32[16,384], index: 0, kind: input, shape index: {}]   ;;  %s983_s1 = inlined_call_operand.hbm [shape: f32[16,384], index: 1, kind: input, shape index: {}]   ;;  %s984_s2 = inlined_call_operand.hbm [shape: f32[1,384], index: 2, kind: input, shape index: {}]   ;;  %s985_s3 = inlined_call_operand.hbm [shape: f32[1,384], index: 3, kind: input, shape index: {}]   ;;  %s986_s4 = inlined_call_operand.hbm [shape: f32[16,384], index: 4, kind: output, shape index: {}]  }
   0x1   :  { %988 = sst [smem:[#allocation18_spill]] %s984_s2 }
   0x2   :  { %989 = sst [smem:[#allocation19_spill]] %s985_s3 }
   0x3   :  { %9 = vsyncpa [#allocation3], 0 }
   0x4   :  { %11 = vsyncpa [#allocation3 + $0x1], 0 }
   0x5   :  { %12 = vsyncpa [#allocation6], 0 }
   0x6   :  { %14 = vsyncpa [#allocation6 + $0x1], 0 }
   0x7   :  { %15 = vsyncpa [#allocation9], 0 }
   0x8   :  { %16 = vsyncpa [#allocation4], 0 }
   0x9   :  { %18 = vsyncpa [#allocation4 + $0x1], 0  ;;  %s809_s15 = smov 0   ;;  %s811_s16 = smov 0  }
   0xa   :  { %s813_s17 = smov 0   ;;  %s815_s18 = smov 0  }
   0xb LB: > { %990 = sst [smem:[#allocation16_spill]] %s775_s17  ;;  %s830_s19 = sadd.s32 4294967295, %s779_s18   ;;  %s779_s18 = sphi %s815_s18, %s1004_s18   ;;  %s775_s17 = sphi %s813_s17, %s1001_s17   ;;  %s771_s16 = sphi %s811_s16, %s1003_s16   ;;  %s767_s15 = sphi %s809_s15, %s1002_s15  }
   0xc   : > { %s485_s20 = sadd.s32 4294967294, %s779_s18   ;;  %p44_p0 = scmp.ne.s32.totalorder %s771_s16, %s767_s15 }
   0xd   : > { %p45_p1 = scmp.eq.s32.totalorder %s830_s19, 0  ;;  %p136_p2 = scmp.eq.s32.totalorder %s830_s19, 1 }
   0xe   : > { %p142_p3 = scmp.eq.s32.totalorder %s485_s20, 1  ;;  %p486_p5 = scmp.ge.s32.totalorder %s779_s18, 1 }
   0xf   : > { %p839_p4 = por %p45_p1, %p44_p0  ;;  %p149_p7 = scmp.lt.s32.totalorder %s779_s18, 3 }
  0x10   : > { %p844_p6 = por %p142_p3, %p44_p0  ;;  %s993_s2 = sld [smem:[#allocation18_spill]] }
  0x11   : > { %p852_p8 = pnand %p486_p5, %p149_p7  ;;  %s781_s27 = smov [#allocation7]  }
  0x12   : > { %s163_s28 = sshll.u32 %s781_s27, 4  ;;  %s995_s3 = sld [smem:[#allocation19_spill]]  ;;  %s164_s28 = int_to_ptr.vmem [resolvable:$true] %s163_s28 }
  0x13   : > { %p518_p10 = pneg %p852_p8  ;;  %s782_s6 = smov [#allocation8]  }
  0x14   : > { %s175_s7 = sshll.u32 %s782_s6, 4  ;;  %s865_s8 = sadd.s32 1, %s779_s18   ;;  %s176_s7 = int_to_ptr.vmem [resolvable:$true] %s175_s7 }
  0x15   : > { %p519_p11 = pnand %p518_p10, %p45_p1  ;;  %s31_s9 = sadd.s32 1, %s775_s17 }
  0x16   : > { %s161_s25 = sshll.u32 %s993_s2, 4  ;;  %s28_s10 = ssub.s32 %s779_s18, %s865_s8  ;;  %s162_s25 = int_to_ptr.hbm [resolvable:$true] %s161_s25 }
  0x17   : > { %521 = dma.hbm_to_vmem [thread:$0]  (!%p519_p11), %s162_s25, 48, %s164_s28, [#allocation6]  }
  0x18   : > { %s173_s5 = sshll.u32 %s995_s3, 4  ;;  %p38_p12 = scmp.ne.s32.totalorder %s775_s17, %s771_s16  ;;  %s174_s5 = int_to_ptr.hbm [resolvable:$true] %s173_s5 }
  0x19   : > { %524 = dma.hbm_to_vmem [thread:$0]  (!%p519_p11), %s174_s5, 48, %s176_s7, [#allocation9]  }
  0x1a   : > { %p29_p13 = scmp.eq.s32.totalorder %s28_s10, 0  ;;  %p39_p0 = scmp.eq.s32.totalorder %s779_s18, 0 }
  0x1b   : > { %p875_p3 = por %p136_p2, %p38_p12  ;;  %p538_p5 = scmp.lt.s32.totalorder %s779_s18, 2 }
  0x1c   : > { %s881_s12 = scalar_select %p29_p13, %s775_s17, %s31_s9  }
  0x1d   : > { %p40_p7 = por %p39_p0, %p38_p12  ;;  %s186_s13 = sand.u32 1, %s775_s17  }
  0x1e   : > { %997 = sst [smem:[#allocation17_spill]] %s881_s12  ;;  %s498_s14 = smul.u32 24, %s186_s13 }
  0x1f   : > { %s499_s20 = smul.u32 24, %s779_s18  ;;  %p885_p10 = pnand %p538_p5, %p40_p7 }
  0x20   : > { %s206_s24 = sand.u32 1, %s779_s18   ;;  %s190_s29 = scalar_lea.vmem [#allocation2], %s498_s14 }
  0x21   : > { %s195_s28 = scalar_lea.hbm %s982_s0, %s499_s20  ;;  %s199_s30 = sshll.u32 %s190_s29, 4  ;;  %s200_s30 = int_to_ptr.vmem [resolvable:$true] %s199_s30 }
  0x22   : > { %s197_s5 = sshll.u32 %s195_s28, 4  ;;  %s187_s6 = scalar_lea.sflag [#allocation3], %s186_s13  ;;  %s198_s5 = int_to_ptr.hbm [resolvable:$true] %s197_s5 }
  0x23   : > { %s641_s7 = sshra.s32 %s198_s5, 4  ;;  %p645_p11 = pneg %p885_p10  ;;  %s642_s7 = int_to_ptr.hbm [resolvable:$true] %s641_s7 }
  0x24   : > { %s643_s9 = scalar_lea.hbm %s642_s7, 24  ;;  %s648_s25 = scalar_lea.hbm %s982_s0, 48 }
  0x25   : > { %p644_p2 = scmp.ne.s32.totalorder %s642_s7, %s643_s9  ;;  %p649_p0 = scmp.lt.s32.totalorder %s642_s7, %s982_s0 }
  0x26   : > { %p650_p5 = scmp.lt.s32.totalorder %s648_s25, %s643_s9 }
  0x27   : > { %p646_p12 = pnand %p645_p11, %p644_p2 }
  0x28   : > { %p651_p7 = por %p650_p5, %p649_p0 }
  0x29   : > { %p647_p13 = pneg %p646_p12 }
  0x2b   : > { %p652_p9 = pnand %p651_p7, %p647_p13 }
  0x2d   : > { %655 = shalt.err (!%p652_p9)
}
  0x2e   : > { %528 = dma.hbm_to_vmem [thread:$0]  (!%p885_p10), %s198_s5, 384, %s200_s30, %s187_s6  }
  0x2f   : > { %s215_s3 = scalar_lea.hbm %s983_s1, %s499_s20  ;;  %s210_s12 = scalar_lea.vmem [#allocation5], %s498_s14 }
  0x30   : > { %s219_s17 = sshll.u32 %s210_s12, 4  ;;  %s217_s2 = sshll.u32 %s215_s3, 4  ;;  %s220_s17 = int_to_ptr.vmem [resolvable:$true] %s219_s17  ;;  %s218_s2 = int_to_ptr.hbm [resolvable:$true] %s217_s2 }
  0x31   : > { %s207_s10 = scalar_lea.sflag [#allocation6], %s206_s24  ;;  %s671_s27 = sshra.s32 %s218_s2, 4  ;;  %s672_s27 = int_to_ptr.hbm [resolvable:$true] %s671_s27 }
  0x32   : > { %s673_s7 = scalar_lea.hbm %s672_s27, 24  ;;  %s678_s5 = scalar_lea.hbm %s983_s1, 48 }
  0x33   : > { %p674_p2 = scmp.ne.s32.totalorder %s672_s27, %s673_s7  ;;  %p679_p13 = scmp.lt.s32.totalorder %s672_s27, %s983_s1 }
  0x34   : > { %p680_p0 = scmp.lt.s32.totalorder %s678_s5, %s673_s7 }
  0x35   : > { %p676_p9 = pnand %p674_p2, %p645_p11 }
  0x36   : > { %p681_p5 = por %p680_p0, %p679_p13 }
  0x37   : > { %p677_p12 = pneg %p676_p9 }
  0x39   : > { %p682_p7 = pnand %p681_p5, %p677_p12 }
  0x3b   : > { %685 = shalt.err (!%p682_p7)
}
  0x3c   : > { %531 = dma.hbm_to_vmem [thread:$0]  (!%p885_p10), %s218_s2, 384, %s220_s17, %s207_s10  }
  0x3d   : > { %228 = sbr.rel (%p852_p8) target bundleno = 358 (0x166), region = 36  ;;  %s923_s3 = sand.u32 (!%p852_p8), 1, %s771_s16  }
  0x3e   : > { %s926_s12 = smul.u32 (!%p852_p8), 24, %s923_s3  ;;  %s231_s14 = scalar_lea.sflag (!%p852_p8), [#allocation3], %s923_s3 }
  0x40   : > { %s234_s24 = scalar_lea.vmem (!%p852_p8), [#allocation2], %s926_s12 }
  0x42   : > { %746 = dma.done.wait (%p839_p4), %s231_s14, 384  }
  0x43   : > { %748 = vsyncadd (%p839_p4), %s231_s14, 4294966912  ;;  %s240_s17 = sand.u32 1, %s830_s19   ;;  %s244_s23 = scalar_lea.vmem [#allocation5], %s926_s12 }
  0x44   : > { %s241_s26 = scalar_lea.sflag [#allocation6], %s240_s17 }
  0x45   : > { %750 = dma.done.wait (%p839_p4), %s241_s26, 384  }
  0x46   : > { %752 = vsyncadd (%p839_p4), %s241_s26, 4294966912 }
  0x47   : > { %754 = dma.done.wait (%p45_p1), [#allocation6], 48  }
  0x48   : > { %756 = vsyncadd (%p45_p1), [#allocation6], 4294967248 }
  0x49   : > { %758 = dma.done.wait (%p45_p1), [#allocation9], 48  }
  0x4a   : > { %760 = vsyncadd (%p45_p1), [#allocation9], 4294967248  ;;  %v285_v0 = vld [vmem:[%s234_s24] sm:$0xff]  ;;  %v286_v1 = vld [vmem:[%s234_s24 + $0x8] sm:$0xff]  ;;  %v783_v11 = vmov 384.0   ;;  %s503_s21 = smul.u32 24, %s830_s19 }
  0x4b   : > { %v287_v2 = vld [vmem:[%s234_s24 + $0x10] sm:$0xff]  ;;  %v289_v4 = vld [vmem:[%s244_s23 + $0x8] sm:$0xff]  ;;  %v290_v5 = vld [vmem:[%s244_s23 + $0x10] sm:$0xff]  ;;  %577 = vrcp.f32 %v783_v11  ;;  %s284_s19 = scalar_lea.vmem [#allocation10], %s926_s12  ;;  %s357_s10 = scalar_lea.sflag [#allocation4], %s923_s3 }
  0x4c   : > { %v288_v3 = vld [vmem:[%s244_s23] sm:$0xff]  ;;  %v292_v7 = vadd.f32 %v289_v4, %v286_v1  ;;  %v293_v8 = vadd.f32 %v290_v5, %v287_v2  ;;  %v331_v35 = vld [vmem:[#allocation7] sm:$0x7]  ;;  %v332_v37 = vld [vmem:[#allocation8] sm:$0x7]  ;;  %s368_s13 = scalar_lea.hbm %s986_s4, %s503_s21  ;;  %s370_s28 = sshll.u32 %s284_s19, 4  ;;  %s371_s28 = int_to_ptr.vmem [resolvable:$true] %s370_s28 }
  0x4d   : > { %v291_v6 = vadd.f32 %v288_v3, %v285_v0  ;;  %v334_v39 = vperm.slane %v331_v35, 0  ;;  %v335_v40 = vperm.slane %v331_v35, 1  ;;  %v336_v41 = vperm.slane %v331_v35, 2  ;;  %s372_s2 = sshll.u32 %s368_s13, 4  ;;  %s721_s5 = scalar_lea.hbm %s986_s4, 48  ;;  %s373_s2 = int_to_ptr.hbm [resolvable:$true] %s372_s2 }
  0x4e   : > { %v344_v42 = vperm.slane %v332_v37, 0  ;;  %v345_v43 = vperm.slane %v332_v37, 1  ;;  %v346_v45 = vperm.slane %v332_v37, 2  ;;  %s715_s27 = sshra.s32 %s373_s2, 4  ;;  %s716_s27 = int_to_ptr.hbm [resolvable:$true] %s715_s27 }
  0x4f   : > { %v294_v9 = vadd.f32 %v292_v7, %v291_v6  ;;  %s717_s7 = scalar_lea.hbm %s716_s27, 24  ;;  %p722_p10 = scmp.lt.s32.totalorder %s716_s27, %s986_s4 }
  0x50   : > { %p718_p1 = scmp.ne.s32.totalorder %s716_s27, %s717_s7  ;;  %p723_p11 = scmp.lt.s32.totalorder %s721_s5, %s717_s7 }
  0x51   : > { %v295_v10 = vadd.f32 %v294_v9, %v293_v8  ;;  %v578_v12 = vpop.eup %577 }
  0x52   : > { %v299_v13 = vmul.f32 384.0, %v578_v12  ;;  %vm303_vm0 = vweird.f32 %v578_v12  ;;  %p719_p4 = pnand %p718_p1, %p875_p3  ;;  %p724_p2 = por %p723_p11, %p722_p10 }
  0x53   : > { %296 = vadd.xlane.f32.xlu0 %v295_v10 }
  0x54   : > { %v300_v14 = vsub.f32 1.0, %v299_v13  ;;  %p720_p8 = pneg %p719_p4 }
  0x56   : > { %v301_v15 = vmul.f32 %v578_v12, %v300_v14  ;;  %p725_p9 = pnand %p724_p2, %p720_p8 }
  0x58   : > { %v302_v16 = vadd.f32 %v578_v12, %v301_v15 }
  0x5a   : > { %v304_v17 = vsel %vm303_vm0, %v578_v12, %v302_v16 }
  0xc6   : > { %v297_v18 = vpop.xlane.xlu0 %296 }
  0xc7   : > { %v305_v19 = vmul.f32 %v304_v17, %v297_v18 }
  0xc9   : > { %v306_v20 = vsub.f32 %v291_v6, %v305_v19  ;;  %v307_v21 = vsub.f32 %v292_v7, %v305_v19  ;;  %v308_v22 = vsub.f32 %v293_v8, %v305_v19 }
  0xcb   : > { %v309_v23 = vmul.f32 %v306_v20, %v306_v20  ;;  %v310_v24 = vmul.f32 %v307_v21, %v307_v21  ;;  %v311_v25 = vmul.f32 %v308_v22, %v308_v22 }
  0xcd   : > { %v312_v26 = vadd.f32 %v310_v24, %v309_v23 }
  0xcf   : > { %v313_v27 = vadd.f32 %v312_v26, %v311_v25 }
  0xd1   : > { %314 = vadd.xlane.f32.xlu0 %v313_v27 }
 0x144   : > { %v315_v28 = vpop.xlane.xlu0 %314 }
 0x145   : > { %v316_v29 = vmul.f32 %v315_v28, %v304_v17 }
 0x147   : > { %v317_v30 = vadd.f32 1e-05, %v316_v29 }
 0x149   : > { %579 = vrsqrt.f32 %v317_v30  ;;  %vm324_vm2 = vweird.f32 %v317_v30 }
 0x14f   : > { %v580_v31 = vpop.eup %579 }
 0x150   : > { %v319_v32 = vmul.f32 %v580_v31, %v317_v30  ;;  %vm325_vm1 = vweird.f32 %v580_v31 }
 0x151   : > { %vm326_vm3 = vmor %vm324_vm2, %vm325_vm1 }
 0x152   : > { %v320_v33 = vmul.f32 %v580_v31, %v319_v32 }
 0x154   : > { %v321_v34 = vmul.f32 0.5, %v320_v33 }
 0x156   : > { %v322_v36 = vsub.f32 1.5, %v321_v34 }
 0x158   : > { %v323_v38 = vmul.f32 %v580_v31, %v322_v36 }
 0x15a   : > { %v327_v44 = vsel %vm326_vm3, %v580_v31, %v323_v38 }
 0x15b   : > { %v328_v46 = vmul.f32 %v327_v44, %v306_v20  ;;  %v329_v47 = vmul.f32 %v327_v44, %v307_v21  ;;  %v330_v48 = vmul.f32 %v327_v44, %v308_v22 }
 0x15d   : > { %v340_v49 = vmul.f32 %v334_v39, %v328_v46  ;;  %v341_v50 = vmul.f32 %v335_v40, %v329_v47  ;;  %v342_v51 = vmul.f32 %v336_v41, %v330_v48 }
 0x15f   : > { %v350_v52 = vadd.f32 %v344_v42, %v340_v49  ;;  %v351_v53 = vadd.f32 %v345_v43, %v341_v50  ;;  %v352_v54 = vadd.f32 %v346_v45, %v342_v51 }
 0x161   : > { %353 = vst [vmem:[%s284_s19] sm:$0xff] %v350_v52 }
 0x162   : > { %354 = vst [vmem:[%s284_s19 + $0x8] sm:$0xff] %v351_v53 }
 0x163   : > { %355 = vst [vmem:[%s284_s19 + $0x10] sm:$0xff] %v352_v54 }
 0x164   : > { %728 = shalt.err (!%p725_p9)
}
 0x165   : > { %516 = dma.vmem_to_hbm [thread:$0]  (%p875_p3), %s371_s28, 384, %s373_s2, %s357_s10  }
 0x166 PF: > { %s384_s3 = sand.u32 1, %s767_s15   ;;  %p999_p12 = scmp.ge.s32.totalorder %s779_s18, 2 }
 0x167   : > { %s385_s12 = scalar_lea.sflag [#allocation4], %s384_s3 }
 0x168   : > { %p533_p13 = pnand %p999_p12, %p844_p6 }
 0x16a   : > { %p534_p0 = pneg %p533_p13 }
 0x16c   : > { %762 = dma.done.wait (%p534_p0), %s385_s12, 384  }
 0x16d   : > { %764 = vsyncadd (%p534_p0), %s385_s12, 4294966912  ;;  %s1000_s14 = sld [smem:[#allocation16_spill]]  ;;  %p21_p5 = scmp.ge.s32.totalorder %s865_s8, 4  }
 0x16e   : > { %s1001_s17 = sld [smem:[#allocation17_spill]]  ;;  %s1002_s15 = smov %s771_s16 }
 0x16f   : > { %s1004_s18 = smov %s865_s8  ;;  %23 = sbr.rel (!%p21_p5) target bundleno = 11 (0xb), region = 102 }
 0x173   : > { %s1003_s16 = smov %s1000_s14 }
 0x174   :  { %391 = vsyncpa [#allocation3], 1 }
 0x175   :  { %393 = vsyncpa [#allocation3 + $0x1], 1 }
 0x176   :  { %394 = vsyncpa [#allocation6], 1 }
 0x177   :  { %396 = vsyncpa [#allocation6 + $0x1], 1 }
 0x178   :  { %397 = vsyncpa [#allocation9], 1 }
 0x179   :  { %398 = vsyncpa [#allocation4], 1 }
 0x17a   :  { %400 = vsyncpa [#allocation4 + $0x1], 1 }

</bundles_post_ra>
